<compile_context>
chip_gen: v7x
topology: tpu7x:2x2x1
jax: 0.10.0
libtpu: 0.0.40
codegen_flags: <defaults>
</compile_context>

<pallas_src>
import functools

import jax
import jax.numpy as jnp
from jax.experimental import pallas as pl
from jax.experimental.pallas import tpu as pltpu


# ----------------------------------------------------------------------------
# Wrapper-side weight folding: stride-2 conv -> shifted block matmuls.
# ----------------------------------------------------------------------------
def _assemble_layer(weight, bias, pack_in, shifts):
    """Fold a Conv1d(k=7, stride=2, pad=3) into shifted block matmuls.

    The layer input is packed `pack_in` consecutive positions per row
    (row s, block i == position pack_in*s + i, channel-minor); the output is
    packed pack_out = pack_in // 2 positions per row.  Then

        out_packed[s] = sum_j in_packed[s + j] @ M[j] + b_packed

    weight: (C_out, C_in, 7) (PyTorch layout), bias: (C_out,).
    Returns M: (len(shifts), pack_in*C_in, pack_out*C_out), b: (1, pack_out*C_out).
    """
    c_out, c_in, kk = weight.shape
    pack_out = pack_in // 2
    wt = jnp.transpose(weight, (2, 1, 0))            # (K, C_in, C_out)
    zero = jnp.zeros((c_in, c_out), weight.dtype)
    blocks = []
    for j in shifts:
        rows = []
        for i in range(pack_in):
            cols = []
            for q in range(pack_out):
                k = i + pack_in * j - 2 * q + 3      # conv tap index
                cols.append(wt[k] if 0 <= k < kk else zero)
            rows.append(jnp.concatenate(cols, axis=1))
        blocks.append(jnp.concatenate(rows, axis=0))
    m = jnp.stack(blocks, axis=0)
    b = jnp.tile(bias, pack_out).reshape(1, pack_out * c_out)
    return m, b


# ----------------------------------------------------------------------------
# Fused 3-layer encoder kernel (one grid step == one batch element).
# ----------------------------------------------------------------------------
def _encoder_kernel(x_ref, m1_ref, b1_ref, m2_ref, b2_ref, m3_ref, b3_ref,
                    o_ref, *, c1, c2, l1_valid, l2_valid):
    x = x_ref[0].astype(jnp.float32)                 # (S, 8*C0)
    s = x.shape[0]

    def conv_packed(h, m_ref, b_ref, front_pad):
        n_shift = m_ref.shape[0]
        w_in = h.shape[1]
        back_pad = n_shift - 1 - front_pad
        hp = jnp.concatenate(
            [jnp.zeros((front_pad, w_in), jnp.float32), h,
             jnp.zeros((back_pad, w_in), jnp.float32)], axis=0)
        acc = jnp.dot(hp[0:s], m_ref[0], preferred_element_type=jnp.float32)
        for idx in range(1, n_shift):
            acc = acc + jnp.dot(hp[idx:idx + s], m_ref[idx],
                                preferred_element_type=jnp.float32)
        acc = acc + b_ref[...]
        return jnp.maximum(acc, 0.0)

    def mask_tail(h, pack, c, valid):
        # Zero out positions beyond the true (unpadded) sequence length so the
        # next layer sees proper zero padding.  No-op when L % 8 == 0.
        if valid >= pack * s:
            return h
        row = jax.lax.broadcasted_iota(jnp.int32, h.shape, 0)
        col = jax.lax.broadcasted_iota(jnp.int32, h.shape, 1)
        pos = row * pack + col // c
        return jnp.where(pos < valid, h, 0.0)

    h1 = conv_packed(x, m1_ref, b1_ref, front_pad=1)     # (S, 4*C1)
    h1 = mask_tail(h1, 4, c1, l1_valid)
    # TODO(synk): nn.Dropout(p=0.2) is identity in eval mode; a training-mode
    # mask would use pltpu.prng_seed / pltpu.prng_random_bits here.
    h2 = conv_packed(h1, m2_ref, b2_ref, front_pad=1)    # (S, 2*C2)
    h2 = mask_tail(h2, 2, c2, l2_valid)
    h3 = conv_packed(h2, m3_ref, b3_ref, front_pad=2)    # (S, C3)
    o_ref[0] = h3.astype(o_ref.dtype)


# ----------------------------------------------------------------------------
# Encoder forward
# ----------------------------------------------------------------------------
def encoder_forward(w, params):
    """w: (B, L, n_features) -> z: (B, latent_size // 4, ceil(L/8))."""
    B, L, C0 = w.shape
    C1 = params["w1"].shape[0]
    C2 = params["w2"].shape[0]
    C3 = params["w3"].shape[0]

    # Conv1d(k=7, s=2, p=3) output lengths (== ceil(len / 2) per layer).
    L1 = (L - 1) // 2 + 1
    L2 = (L1 - 1) // 2 + 1
    L3 = (L2 - 1) // 2 + 1

    S = pl.cdiv(L, 8)
    Lp = 8 * S
    x = w.astype(jnp.float32)
    if Lp != L:
        x = jnp.pad(x, ((0, 0), (0, Lp - L), (0, 0)))
    # Free (contiguous) reshape: 8 consecutive positions packed into lanes.
    x8 = x.reshape(B, S, 8 * C0)

    m1, b1 = _assemble_layer(params["w1"], params["b1"], 8, (-1, 0, 1))
    m2, b2 = _assemble_layer(params["w2"], params["b2"], 4, (-1, 0, 1))
    m3, b3 = _assemble_layer(params["w3"], params["b3"], 2, (-2, -1, 0, 1))

    kernel = functools.partial(_encoder_kernel, c1=C1, c2=C2,
                               l1_valid=L1, l2_valid=L2)

    flops = 2 * B * S * (3 * (8 * C0) * (4 * C1)
                         + 3 * (4 * C1) * (2 * C2)
                         + 4 * (2 * C2) * C3)
    bytes_accessed = 4 * (B * S * 8 * C0 + B * S * C3
                          + m1.size + m2.size + m3.size
                          + b1.size + b2.size + b3.size)

    out = pl.pallas_call(
        kernel,
        out_shape=jax.ShapeDtypeStruct((B, S, C3), jnp.float32),
        grid=(B,),
        in_specs=[
            pl.BlockSpec((1, S, 8 * C0), lambda b: (b, 0, 0)),
            pl.BlockSpec((3, 8 * C0, 4 * C1), lambda b: (0, 0, 0)),
            pl.BlockSpec((1, 4 * C1), lambda b: (0, 0)),
            pl.BlockSpec((3, 4 * C1, 2 * C2), lambda b: (0, 0, 0)),
            pl.BlockSpec((1, 2 * C2), lambda b: (0, 0)),
            pl.BlockSpec((4, 2 * C2, C3), lambda b: (0, 0, 0)),
            pl.BlockSpec((1, C3), lambda b: (0, 0)),
        ],
        out_specs=pl.BlockSpec((1, S, C3), lambda b: (b, 0, 0)),
        compiler_params=pltpu.CompilerParams(
            dimension_semantics=("parallel",)),
        cost_estimate=pl.CostEstimate(flops=flops, transcendentals=0,
                                      bytes_accessed=bytes_accessed),
    )(x8, m1, b1, m2, b2, m3, b3)

    z = out[:, :L3, :]                      # drop padded tail positions
    return jnp.transpose(z, (0, 2, 1))      # single final transpose to NCL


# ----------------------------------------------------------------------------
# Deterministic parameter init (Conv1d-style uniform(-1/sqrt(fan_in), +...))
# ----------------------------------------------------------------------------
def init_params(key, n_features, latent_size, kernel_size=7):
    def conv_init(k, c_out, c_in):
        kw, kb = jax.random.split(k)
        bound = 1.0 / jnp.sqrt(c_in * kernel_size)
        w = jax.random.uniform(kw, (c_out, c_in, kernel_size), jnp.float32,
                               minval=-bound, maxval=bound)
        b = jax.random.uniform(kb, (c_out,), jnp.float32,
                               minval=-bound, maxval=bound)
        return w, b

    k1, k2, k3 = jax.random.split(key, 3)
    w1, b1 = conv_init(k1, latent_size, n_features)
    w2, b2 = conv_init(k2, latent_size // 2, latent_size)
    w3, b3 = conv_init(k3, latent_size // 4, latent_size // 2)
    return {"w1": w1, "b1": b1, "w2": w2, "b2": b2, "w3": w3, "b3": b3}


# ----------------------------------------------------------------------------
# Pure-JAX reference (for correctness check)
# ----------------------------------------------------------------------------
def _conv1d_relu_ref(x, weight, bias, stride=2, padding=3):
    out = jax.lax.conv_general_dilated(
        x, weight, window_strides=(stride,), padding=[(padding, padding)],
        dimension_numbers=("NCH", "OIH", "NCH"))
    return jax.nn.relu(out + bias[None, :, None])


def encoder_ref(w, params):
    x = jnp.transpose(w, (0, 2, 1))
    out = _conv1d_relu_ref(x, params["w1"], params["b1"])
    out = _conv1d_relu_ref(out, params["w2"], params["b2"])
    return _conv1d_relu_ref(out, params["w3"], params["b3"])


if __name__ == "__main__":
    n_features = 4
    latent_size = 32
    B = 2

    key = jax.random.PRNGKey(0)
    k_in, k_in2, k_params = jax.random.split(key, 3)
    params = init_params(k_params, n_features, latent_size)

    fwd = jax.jit(functools.partial(encoder_forward, params=params))

    # 1) aligned length (L % 8 == 0)
    L = 16
    w_in = jax.random.normal(k_in, (B, L, n_features), jnp.float32)
    z = fwd(w_in)
    jax.block_until_ready(z)
    z_ref = encoder_ref(w_in, params)
    assert z.shape == (B, latent_size // 4, 2), z.shape
    assert jnp.allclose(z, z_ref, atol=1e-4, rtol=1e-4), \
        float(jnp.max(jnp.abs(z - z_ref)))

    # 2) ragged length (exercises in-kernel tail masking)
    L_r = 13
    w_in2 = jax.random.normal(k_in2, (B, L_r, n_features), jnp.float32)
    z2 = jax.jit(functools.partial(encoder_forward, params=params))(w_in2)
    jax.block_until_ready(z2)
    z2_ref = encoder_ref(w_in2, params)
    assert z2.shape == z2_ref.shape, (z2.shape, z2_ref.shape)
    assert jnp.allclose(z2, z2_ref, atol=1e-4, rtol=1e-4), \
        float(jnp.max(jnp.abs(z2 - z2_ref)))

    print("KERNEL_OK")
</pallas_src>

<mosaic_0001>
module attributes {stable_mosaic.version = 11 : i64} {
  func.func @_encoder_kernel(%arg0: i32, %arg1: memref<1x2x32xf32, #tpu.memory_space<vmem>>, %arg2: memref<3x32x128xf32, #tpu.memory_space<vmem>>, %arg3: memref<1x128xf32, #tpu.memory_space<vmem>>, %arg4: memref<3x128x32xf32, #tpu.memory_space<vmem>>, %arg5: memref<1x32xf32, #tpu.memory_space<vmem>>, %arg6: memref<4x32x8xf32, #tpu.memory_space<vmem>>, %arg7: memref<1x8xf32, #tpu.memory_space<vmem>>, %arg8: memref<1x2x8xf32, #tpu.memory_space<vmem>>) attributes {dimension_semantics = [#tpu.dimension_semantics<parallel>], iteration_bounds = array<i64: 2>, scalar_prefetch = 0 : i64, scratch_operands = 0 : i64, tpu.core_type = #tpu.core_type<tc>, window_params = [{transform_indices = @transform_0, window_bounds = array<i64: 1, 2, 32>}, {pipeline_mode = #tpu.pipeline_mode<synchronous>, transform_indices = @transform_1, window_bounds = array<i64: 3, 32, 128>}, {pipeline_mode = #tpu.pipeline_mode<synchronous>, transform_indices = @transform_2, window_bounds = array<i64: 1, 128>}, {pipeline_mode = #tpu.pipeline_mode<synchronous>, transform_indices = @transform_3, window_bounds = array<i64: 3, 128, 32>}, {pipeline_mode = #tpu.pipeline_mode<synchronous>, transform_indices = @transform_4, window_bounds = array<i64: 1, 32>}, {pipeline_mode = #tpu.pipeline_mode<synchronous>, transform_indices = @transform_5, window_bounds = array<i64: 4, 32, 8>}, {pipeline_mode = #tpu.pipeline_mode<synchronous>, transform_indices = @transform_6, window_bounds = array<i64: 1, 8>}, {transform_indices = @transform_7, window_bounds = array<i64: 1, 2, 8>}]} {
    %c0 = arith.constant 0 : index
    %c0_0 = arith.constant 0 : index
    %c0_1 = arith.constant 0 : index
    %0 = vector.load %arg1[%c0, %c0_0, %c0_1] : memref<1x2x32xf32, #tpu.memory_space<vmem>>, vector<1x2x32xf32>
    %1 = vector.shape_cast %0 : vector<1x2x32xf32> to vector<2x32xf32>
    %cst = arith.constant 0.000000e+00 : f32
    %2 = vector.broadcast %cst : f32 to vector<1x32xf32>
    %cst_2 = arith.constant 0.000000e+00 : f32
    %3 = vector.broadcast %cst_2 : f32 to vector<1x32xf32>
    %4 = tpu.concatenate %2, %1, %3 in 0 : vector<1x32xf32>, vector<2x32xf32>, vector<1x32xf32> -> vector<4x32xf32>
    %5 = vector.extract_strided_slice %4 {offsets = [0, 0], sizes = [2, 32], strides = [1, 1]} : vector<4x32xf32> to vector<2x32xf32>
    %c0_3 = arith.constant 0 : index
    %c0_4 = arith.constant 0 : index
    %c0_5 = arith.constant 0 : index
    %6 = vector.load %arg2[%c0_3, %c0_4, %c0_5] : memref<3x32x128xf32, #tpu.memory_space<vmem>>, vector<1x32x128xf32>
    %7 = vector.shape_cast %6 : vector<1x32x128xf32> to vector<32x128xf32>
    %cst_6 = arith.constant dense<0.000000e+00> : vector<2x128xf32>
    %8 = tpu.matmul %5, %7, %cst_6 {dimension_numbers = #tpu.dot_dimension_numbers<[1], [0], [0], [1], [0, 0, 1, 1], [], []>} : vector<2x32xf32>, vector<32x128xf32>, vector<2x128xf32> -> vector<2x128xf32>
    %9 = vector.extract_strided_slice %4 {offsets = [1, 0], sizes = [2, 32], strides = [1, 1]} : vector<4x32xf32> to vector<2x32xf32>
    %c1 = arith.constant 1 : index
    %c0_7 = arith.constant 0 : index
    %c0_8 = arith.constant 0 : index
    %10 = vector.load %arg2[%c1, %c0_7, %c0_8] : memref<3x32x128xf32, #tpu.memory_space<vmem>>, vector<1x32x128xf32>
    %11 = vector.shape_cast %10 : vector<1x32x128xf32> to vector<32x128xf32>
    %cst_9 = arith.constant dense<0.000000e+00> : vector<2x128xf32>
    %12 = tpu.matmul %9, %11, %cst_9 {dimension_numbers = #tpu.dot_dimension_numbers<[1], [0], [0], [1], [0, 0, 1, 1], [], []>} : vector<2x32xf32>, vector<32x128xf32>, vector<2x128xf32> -> vector<2x128xf32>
    %13 = arith.addf %8, %12 : vector<2x128xf32>
    %14 = vector.extract_strided_slice %4 {offsets = [2, 0], sizes = [2, 32], strides = [1, 1]} : vector<4x32xf32> to vector<2x32xf32>
    %c2 = arith.constant 2 : index
    %c0_10 = arith.constant 0 : index
    %c0_11 = arith.constant 0 : index
    %15 = vector.load %arg2[%c2, %c0_10, %c0_11] : memref<3x32x128xf32, #tpu.memory_space<vmem>>, vector<1x32x128xf32>
    %16 = vector.shape_cast %15 : vector<1x32x128xf32> to vector<32x128xf32>
    %cst_12 = arith.constant dense<0.000000e+00> : vector<2x128xf32>
    %17 = tpu.matmul %14, %16, %cst_12 {dimension_numbers = #tpu.dot_dimension_numbers<[1], [0], [0], [1], [0, 0, 1, 1], [], []>} : vector<2x32xf32>, vector<32x128xf32>, vector<2x128xf32> -> vector<2x128xf32>
    %18 = arith.addf %13, %17 : vector<2x128xf32>
    %c0_13 = arith.constant 0 : index
    %c0_14 = arith.constant 0 : index
    %19 = vector.load %arg3[%c0_13, %c0_14] : memref<1x128xf32, #tpu.memory_space<vmem>>, vector<1x128xf32>
    %20 = vector.broadcast %19 : vector<1x128xf32> to vector<2x128xf32>
    %21 = arith.addf %18, %20 : vector<2x128xf32>
    %cst_15 = arith.constant 0.000000e+00 : f32
    %22 = vector.broadcast %cst_15 : f32 to vector<2x128xf32>
    %23 = arith.maximumf %21, %22 : vector<2x128xf32>
    %cst_16 = arith.constant 0.000000e+00 : f32
    %24 = vector.broadcast %cst_16 : f32 to vector<1x128xf32>
    %cst_17 = arith.constant 0.000000e+00 : f32
    %25 = vector.broadcast %cst_17 : f32 to vector<1x128xf32>
    %26 = tpu.concatenate %24, %23, %25 in 0 : vector<1x128xf32>, vector<2x128xf32>, vector<1x128xf32> -> vector<4x128xf32>
    %27 = vector.extract_strided_slice %26 {offsets = [0, 0], sizes = [2, 128], strides = [1, 1]} : vector<4x128xf32> to vector<2x128xf32>
    %c0_18 = arith.constant 0 : index
    %c0_19 = arith.constant 0 : index
    %c0_20 = arith.constant 0 : index
    %28 = vector.load %arg4[%c0_18, %c0_19, %c0_20] : memref<3x128x32xf32, #tpu.memory_space<vmem>>, vector<1x128x32xf32>
    %29 = vector.shape_cast %28 : vector<1x128x32xf32> to vector<128x32xf32>
    %cst_21 = arith.constant dense<0.000000e+00> : vector<2x32xf32>
    %30 = tpu.matmul %27, %29, %cst_21 {dimension_numbers = #tpu.dot_dimension_numbers<[1], [0], [0], [1], [0, 0, 1, 1], [], []>} : vector<2x128xf32>, vector<128x32xf32>, vector<2x32xf32> -> vector<2x32xf32>
    %31 = vector.extract_strided_slice %26 {offsets = [1, 0], sizes = [2, 128], strides = [1, 1]} : vector<4x128xf32> to vector<2x128xf32>
    %c1_22 = arith.constant 1 : index
    %c0_23 = arith.constant 0 : index
    %c0_24 = arith.constant 0 : index
    %32 = vector.load %arg4[%c1_22, %c0_23, %c0_24] : memref<3x128x32xf32, #tpu.memory_space<vmem>>, vector<1x128x32xf32>
    %33 = vector.shape_cast %32 : vector<1x128x32xf32> to vector<128x32xf32>
    %cst_25 = arith.constant dense<0.000000e+00> : vector<2x32xf32>
    %34 = tpu.matmul %31, %33, %cst_25 {dimension_numbers = #tpu.dot_dimension_numbers<[1], [0], [0], [1], [0, 0, 1, 1], [], []>} : vector<2x128xf32>, vector<128x32xf32>, vector<2x32xf32> -> vector<2x32xf32>
    %35 = arith.addf %30, %34 : vector<2x32xf32>
    %36 = vector.extract_strided_slice %26 {offsets = [2, 0], sizes = [2, 128], strides = [1, 1]} : vector<4x128xf32> to vector<2x128xf32>
    %c2_26 = arith.constant 2 : index
    %c0_27 = arith.constant 0 : index
    %c0_28 = arith.constant 0 : index
    %37 = vector.load %arg4[%c2_26, %c0_27, %c0_28] : memref<3x128x32xf32, #tpu.memory_space<vmem>>, vector<1x128x32xf32>
    %38 = vector.shape_cast %37 : vector<1x128x32xf32> to vector<128x32xf32>
    %cst_29 = arith.constant dense<0.000000e+00> : vector<2x32xf32>
    %39 = tpu.matmul %36, %38, %cst_29 {dimension_numbers = #tpu.dot_dimension_numbers<[1], [0], [0], [1], [0, 0, 1, 1], [], []>} : vector<2x128xf32>, vector<128x32xf32>, vector<2x32xf32> -> vector<2x32xf32>
    %40 = arith.addf %35, %39 : vector<2x32xf32>
    %c0_30 = arith.constant 0 : index
    %c0_31 = arith.constant 0 : index
    %41 = vector.load %arg5[%c0_30, %c0_31] : memref<1x32xf32, #tpu.memory_space<vmem>>, vector<1x32xf32>
    %42 = vector.broadcast %41 : vector<1x32xf32> to vector<2x32xf32>
    %43 = arith.addf %40, %42 : vector<2x32xf32>
    %cst_32 = arith.constant 0.000000e+00 : f32
    %44 = vector.broadcast %cst_32 : f32 to vector<2x32xf32>
    %45 = arith.maximumf %43, %44 : vector<2x32xf32>
    %cst_33 = arith.constant 0.000000e+00 : f32
    %46 = vector.broadcast %cst_33 : f32 to vector<2x32xf32>
    %cst_34 = arith.constant 0.000000e+00 : f32
    %47 = vector.broadcast %cst_34 : f32 to vector<1x32xf32>
    %48 = tpu.concatenate %46, %45, %47 in 0 : vector<2x32xf32>, vector<2x32xf32>, vector<1x32xf32> -> vector<5x32xf32>
    %49 = vector.extract_strided_slice %48 {offsets = [0, 0], sizes = [2, 32], strides = [1, 1]} : vector<5x32xf32> to vector<2x32xf32>
    %c0_35 = arith.constant 0 : index
    %c0_36 = arith.constant 0 : index
    %c0_37 = arith.constant 0 : index
    %50 = vector.load %arg6[%c0_35, %c0_36, %c0_37] : memref<4x32x8xf32, #tpu.memory_space<vmem>>, vector<1x32x8xf32>
    %51 = vector.shape_cast %50 : vector<1x32x8xf32> to vector<32x8xf32>
    %cst_38 = arith.constant dense<0.000000e+00> : vector<2x8xf32>
    %52 = tpu.matmul %49, %51, %cst_38 {dimension_numbers = #tpu.dot_dimension_numbers<[1], [0], [0], [1], [0, 0, 1, 1], [], []>} : vector<2x32xf32>, vector<32x8xf32>, vector<2x8xf32> -> vector<2x8xf32>
    %53 = vector.extract_strided_slice %48 {offsets = [1, 0], sizes = [2, 32], strides = [1, 1]} : vector<5x32xf32> to vector<2x32xf32>
    %c1_39 = arith.constant 1 : index
    %c0_40 = arith.constant 0 : index
    %c0_41 = arith.constant 0 : index
    %54 = vector.load %arg6[%c1_39, %c0_40, %c0_41] : memref<4x32x8xf32, #tpu.memory_space<vmem>>, vector<1x32x8xf32>
    %55 = vector.shape_cast %54 : vector<1x32x8xf32> to vector<32x8xf32>
    %cst_42 = arith.constant dense<0.000000e+00> : vector<2x8xf32>
    %56 = tpu.matmul %53, %55, %cst_42 {dimension_numbers = #tpu.dot_dimension_numbers<[1], [0], [0], [1], [0, 0, 1, 1], [], []>} : vector<2x32xf32>, vector<32x8xf32>, vector<2x8xf32> -> vector<2x8xf32>
    %57 = arith.addf %52, %56 : vector<2x8xf32>
    %58 = vector.extract_strided_slice %48 {offsets = [2, 0], sizes = [2, 32], strides = [1, 1]} : vector<5x32xf32> to vector<2x32xf32>
    %c2_43 = arith.constant 2 : index
    %c0_44 = arith.constant 0 : index
    %c0_45 = arith.constant 0 : index
    %59 = vector.load %arg6[%c2_43, %c0_44, %c0_45] : memref<4x32x8xf32, #tpu.memory_space<vmem>>, vector<1x32x8xf32>
    %60 = vector.shape_cast %59 : vector<1x32x8xf32> to vector<32x8xf32>
    %cst_46 = arith.constant dense<0.000000e+00> : vector<2x8xf32>
    %61 = tpu.matmul %58, %60, %cst_46 {dimension_numbers = #tpu.dot_dimension_numbers<[1], [0], [0], [1], [0, 0, 1, 1], [], []>} : vector<2x32xf32>, vector<32x8xf32>, vector<2x8xf32> -> vector<2x8xf32>
    %62 = arith.addf %57, %61 : vector<2x8xf32>
    %63 = vector.extract_strided_slice %48 {offsets = [3, 0], sizes = [2, 32], strides = [1, 1]} : vector<5x32xf32> to vector<2x32xf32>
    %c3 = arith.constant 3 : index
    %c0_47 = arith.constant 0 : index
    %c0_48 = arith.constant 0 : index
    %64 = vector.load %arg6[%c3, %c0_47, %c0_48] : memref<4x32x8xf32, #tpu.memory_space<vmem>>, vector<1x32x8xf32>
    %65 = vector.shape_cast %64 : vector<1x32x8xf32> to vector<32x8xf32>
    %cst_49 = arith.constant dense<0.000000e+00> : vector<2x8xf32>
    %66 = tpu.matmul %63, %65, %cst_49 {dimension_numbers = #tpu.dot_dimension_numbers<[1], [0], [0], [1], [0, 0, 1, 1], [], []>} : vector<2x32xf32>, vector<32x8xf32>, vector<2x8xf32> -> vector<2x8xf32>
    %67 = arith.addf %62, %66 : vector<2x8xf32>
    %c0_50 = arith.constant 0 : index
    %c0_51 = arith.constant 0 : index
    %68 = vector.load %arg7[%c0_50, %c0_51] : memref<1x8xf32, #tpu.memory_space<vmem>>, vector<1x8xf32>
    %69 = vector.broadcast %68 : vector<1x8xf32> to vector<2x8xf32>
    %70 = arith.addf %67, %69 : vector<2x8xf32>
    %cst_52 = arith.constant 0.000000e+00 : f32
    %71 = vector.broadcast %cst_52 : f32 to vector<2x8xf32>
    %72 = arith.maximumf %70, %71 : vector<2x8xf32>
    %c0_53 = arith.constant 0 : index
    %c0_54 = arith.constant 0 : index
    %c0_55 = arith.constant 0 : index
    %73 = vector.load %arg8[%c0_53, %c0_54, %c0_55] : memref<1x2x8xf32, #tpu.memory_space<vmem>>, vector<1x2x8xf32>
    %74 = vector.shape_cast %73 : vector<1x2x8xf32> to vector<2x8xf32>
    %75 = vector.shape_cast %72 : vector<2x8xf32> to vector<1x2x8xf32>
    tpu.vector_store %arg8[%c0_53, %c0_54, %c0_55], %75 {strides = array<i32>} : memref<1x2x8xf32, #tpu.memory_space<vmem>>, vector<1x2x8xf32>,
    return
  }
  func.func @transform_0(%arg0: i32) -> (i32, i32, i32) {
    %c0_i32 = arith.constant 0 : i32
    %c0_i32_0 = arith.constant 0 : i32
    %c0_i32_1 = arith.constant 0 : i32
    return %arg0, %c0_i32, %c0_i32_0 : i32, i32, i32
  }
  func.func @transform_1(%arg0: i32) -> (i32, i32, i32) {
    %c0_i32 = arith.constant 0 : i32
    %c0_i32_0 = arith.constant 0 : i32
    %c0_i32_1 = arith.constant 0 : i32
    %c0_i32_2 = arith.constant 0 : i32
    return %c0_i32, %c0_i32_0, %c0_i32_1 : i32, i32, i32
  }
  func.func @transform_2(%arg0: i32) -> (i32, i32) {
    %c0_i32 = arith.constant 0 : i32
    %c0_i32_0 = arith.constant 0 : i32
    %c0_i32_1 = arith.constant 0 : i32
    return %c0_i32, %c0_i32_0 : i32, i32
  }
  func.func @transform_3(%arg0: i32) -> (i32, i32, i32) {
    %c0_i32 = arith.constant 0 : i32
    %c0_i32_0 = arith.constant 0 : i32
    %c0_i32_1 = arith.constant 0 : i32
    %c0_i32_2 = arith.constant 0 : i32
    return %c0_i32, %c0_i32_0, %c0_i32_1 : i32, i32, i32
  }
  func.func @transform_4(%arg0: i32) -> (i32, i32) {
    %c0_i32 = arith.constant 0 : i32
    %c0_i32_0 = arith.constant 0 : i32
    %c0_i32_1 = arith.constant 0 : i32
    return %c0_i32, %c0_i32_0 : i32, i32
  }
  func.func @transform_5(%arg0: i32) -> (i32, i32, i32) {
    %c0_i32 = arith.constant 0 : i32
    %c0_i32_0 = arith.constant 0 : i32
    %c0_i32_1 = arith.constant 0 : i32
    %c0_i32_2 = arith.constant 0 : i32
    return %c0_i32, %c0_i32_0, %c0_i32_1 : i32, i32, i32
  }
  func.func @transform_6(%arg0: i32) -> (i32, i32) {
    %c0_i32 = arith.constant 0 : i32
    %c0_i32_0 = arith.constant 0 : i32
    %c0_i32_1 = arith.constant 0 : i32
    return %c0_i32, %c0_i32_0 : i32, i32
  }
  func.func @transform_7(%arg0: i32) -> (i32, i32, i32) {
    %c0_i32 = arith.constant 0 : i32
    %c0_i32_0 = arith.constant 0 : i32
    %c0_i32_1 = arith.constant 0 : i32
    return %arg0, %c0_i32, %c0_i32_0 : i32, i32, i32
  }
}

</mosaic_0001>

<bundles_post_ra>
// kernel: tile.11
= control target key start
LH: loop header
LB: loop body
LE: loop exit
PB: predicated region body
PF: predicated region fallthrough
CT: control target
= control target key end

     0   :  { %vm7_vm0 = vcmask 261120   ;;  %s37_s8 = smov 32   ;;  %s38_s9 = smov 64   ;;  %vm13_vm1 = vcmask 1048320   ;;  %vm19_vm2 = vcmask 785920   ;;  %vm25_vm3 = vcmask 523520   ;;  %s55_s0 = inlined_call_operand.vmem [shape: f32[4,32], index: 0, kind: input, shape index: {}]   ;;  %s56_s1 = inlined_call_operand.vmem [shape: f32[1,128], index: 1, kind: output, shape index: {}]  }
   0x1   :  { %v4_v0 = vld [vmem:[%s55_s0] sm:$0xf]  ;;  %s36_s0 = smov 96  }
   0x2   :  { %5 = vst [vmem:[#allocation1] sm:$0xf] %v4_v0 }
   0x9   :  { %v10_v1 = vld [vmem:[#allocation1 + $0x3] sm:$0x1]   ;;  %v22_v2 = vld [vmem:[#allocation1 + $0x1] sm:$0x1]   ;;  %v6_v3 = vld [vmem:[#allocation1] sm:$0x1]  }
   0xa   :  { %11 = vrot.lane.b32.xlu0 %v10_v1, %s36_s0  ;;  %23 = vrot.lane.b32.xlu1 %v22_v2, %s37_s8  ;;  %v16_v4 = vld [vmem:[#allocation1 + $0x2] sm:$0x1]   ;;  %8 = vst.msk [vmem:[#allocation0] sm:$0x1] %vm7_vm0, %v6_v3  }
   0xe   :  { %17 = vrot.lane.b32.xlu0 %v16_v4, %s38_s9 }
  0x7c   :  { %v12_v5 = vpop.permute.xlu0 %11   ;;  %v24_v6 = vpop.permute.xlu1 %23  }
  0x7d   :  { %14 = vst.msk [vmem:[#allocation0] sm:$0x1] %vm13_vm1, %v12_v5  }
  0x80   :  { %v18_v7 = vpop.permute.xlu0 %17  }
  0x81   :  { %20 = vst.msk [vmem:[#allocation0] sm:$0x1] %vm19_vm2, %v18_v7  }
  0x82   :  { %26 = vst.msk [vmem:[#allocation0] sm:$0x1] %vm25_vm3, %v24_v6  }
  0x89   :  { %v30_v8 = vld [vmem:[#allocation0] sm:$0x1] }
  0x8a   :  { %32 = vst [vmem:[%s56_s1] sm:$0x1] %v30_v8 }

// kernel: tile.10
= control target key start
LH: loop header
LB: loop body
LE: loop exit
PB: predicated region body
PF: predicated region fallthrough
CT: control target
= control target key end

     0   :  { %s22_s0 = inlined_call_operand.vmem [shape: f32[32], index: 0, kind: input, shape index: {}]   ;;  %s23_s1 = inlined_call_operand.vmem [shape: f32[4,32], index: 1, kind: output, shape index: {}]  }
   0x1   :  { %v4_v0 = vld [vmem:[%s22_s0] ss:$0 sm:$0xff] }
   0x2   :  { %5 = vst [vmem:[%s23_s1] sm:$0xf] %v4_v0 }

// kernel: tile.14
= control target key start
LH: loop header
LB: loop body
LE: loop exit
PB: predicated region body
PF: predicated region fallthrough
CT: control target
= control target key end

     0   :  { %s22_s0 = inlined_call_operand.vmem [shape: f32[16], index: 0, kind: input, shape index: {}]   ;;  %s23_s1 = inlined_call_operand.vmem [shape: f32[2,16], index: 1, kind: output, shape index: {}]  }
   0x1   :  { %v4_v0 = vld [vmem:[%s22_s0] ss:$0 sm:$0xff] }
   0x2   :  { %5 = vst [vmem:[%s23_s1] sm:$0x3] %v4_v0 }

// kernel: tile.15
= control target key start
LH: loop header
LB: loop body
LE: loop exit
PB: predicated region body
PF: predicated region fallthrough
CT: control target
= control target key end

     0   :  { %vm7_vm0 = vcmask 130048   ;;  %vm13_vm1 = vcmask 261248   ;;  %s39_s0 = inlined_call_operand.vmem [shape: f32[2,16], index: 0, kind: input, shape index: {}]   ;;  %s40_s1 = inlined_call_operand.vmem [shape: f32[1,32], index: 1, kind: output, shape index: {}]  }
   0x1   :  { %v4_v0 = vld [vmem:[%s39_s0] sm:$0x3]  ;;  %s22_s0 = smov 16  }
   0x2   :  { %5 = vst [vmem:[#allocation1] sm:$0x3] %v4_v0 }
   0x9   :  { %v10_v1 = vld [vmem:[#allocation1 + $0x1] sm:$0x1]   ;;  %v6_v2 = vld [vmem:[#allocation1] sm:$0x1]  }
   0xa   :  { %11 = vrot.lane.b32.xlu0 %v10_v1, %s22_s0  ;;  %8 = vst.msk [vmem:[#allocation0] sm:$0x1] %vm7_vm0, %v6_v2  }
  0x7c   :  { %v12_v3 = vpop.permute.xlu0 %11  }
  0x7d   :  { %14 = vst.msk [vmem:[#allocation0] sm:$0x1] %vm13_vm1, %v12_v3  }
  0x84   :  { %v18_v4 = vld [vmem:[#allocation0] sm:$0x1] }
  0x85   :  { %20 = vst [vmem:[%s40_s1] sm:$0x1] %v18_v4 }

// kernel: encoder_forward.1
= control target key start
LH: loop header
LB: loop body
LE: loop exit
PB: predicated region body
PF: predicated region fallthrough
CT: control target
= control target key end

     0   :  { %12 = vsyncpa [#allocation3], 0  ;;  %s2205_s0 = inlined_call_operand.vmem [shape: f32[2,2,32], index: 0, kind: input, shape index: {}]   ;;  %s2206_s1 = inlined_call_operand.vmem [shape: f32[3,32,128], index: 1, kind: input, shape index: {}]   ;;  %s2207_s2 = inlined_call_operand.vmem [shape: f32[1,128], index: 2, kind: input, shape index: {}]   ;;  %s2208_s3 = inlined_call_operand.hbm [shape: f32[3,128,32], index: 3, kind: input, shape index: {}]   ;;  %s2209_s4 = inlined_call_operand.vmem [shape: f32[1,32], index: 4, kind: input, shape index: {}]   ;;  %s2210_s5 = inlined_call_operand.hbm [shape: f32[4,32,8], index: 5, kind: input, shape index: {}]   ;;  %s2211_s6 = inlined_call_operand.vmem [shape: f32[1,8], index: 6, kind: input, shape index: {}]   ;;  %s2212_s7 = inlined_call_operand.hbm [shape: f32[2,2,8], index: 7, kind: output, shape index: {}]  }
   0x1   :  { %13 = vsyncpa [#allocation6], 0 }
   0x2   :  { %14 = vsyncpa [#allocation4], 0 }
   0x3   :  { %16 = vsyncpa [#allocation4 + $0x1], 0  ;;  %s1918_s24 = smov 0   ;;  %s1920_s25 = smov 0  }
   0x4   :  { %s1922_s26 = smov 0   ;;  %s1924_s27 = smov 0  }
   0x5 LB: > { %s1939_s28 = sadd.s32 4294967295, %s1868_s27   ;;  %s1262_s29 = sadd.s32 4294967294, %s1868_s27   ;;  %s1868_s27 = sphi %s1924_s27, %s2232_s27   ;;  %s1864_s26 = sphi %s1922_s26, %s2231_s26   ;;  %s1860_s25 = sphi %s1920_s25, %s2230_s25   ;;  %s1856_s24 = sphi %s1918_s24, %s2229_s24  }
   0x6   : > { %s1943_s30 = sadd.s32 1, %s1868_s27   ;;  %s181_s8 = sadd.s32 1, %s1864_s26 }
   0x7   : > { %s178_s9 = ssub.s32 %s1868_s27, %s1943_s30  ;;  %p191_p0 = scmp.ne.s32.totalorder %s1864_s26, %s1860_s25 }
   0x8   : > { %p179_p1 = scmp.eq.s32.totalorder %s178_s9, 0  ;;  %p192_p2 = scmp.eq.s32.totalorder %s1939_s28, 1 }
   0x9   : > { %p197_p3 = scmp.ne.s32.totalorder %s1860_s25, %s1856_s24  ;;  %p198_p4 = scmp.eq.s32.totalorder %s1262_s29, 1 }
   0xa   : > { %s1954_s10 = scalar_select %p179_p1, %s1864_s26, %s181_s8  }
   0xb   : > { %p1956_p5 = por %p192_p2, %p191_p0  ;;  %p1960_p6 = por %p198_p4, %p197_p3 }
   0xc   : > { %2216 = sst [smem:[#allocation11_spill]] %s1954_s10  ;;  %p1263_p7 = scmp.ge.s32.totalorder %s1868_s27, 1 }
   0xd   : > { %s2217_s11 = scalar_select %p1956_p5, 1, 0 }
   0xe   : > { %s2218_s12 = scalar_select %p1960_p6, 1, 0 }
   0xf   : > { %p205_p8 = scmp.lt.s32.totalorder %s1868_s27, 3  ;;  %p2213_p9 = scmp.eq.s32.totalorder %s1939_s28, 0 }
  0x10   : > { %s1870_s14 = smov [#allocation2]   ;;  %s1871_s17 = smov [#allocation5]  }
  0x11   : > { %p1967_p10 = pnand %p1263_p7, %p205_p8  ;;  %s223_s15 = sshll.u32 %s1870_s14, 4  ;;  %s224_s15 = int_to_ptr.vmem [resolvable:$true] %s223_s15 }
  0x12   : > { %s239_s18 = sshll.u32 %s1871_s17, 4  ;;  %s1742_s21 = scalar_lea.hbm %s2208_s3, 6144  ;;  %s1979_s18 = int_to_ptr.vmem [resolvable:$true] %s239_s18 }
  0x13   : > { %s2219_s13 = scalar_select %p1967_p10, 1, 0 }
  0x14   : > { %p1687_p11 = pneg %p1967_p10  ;;  %p1743_p13 = scmp.ne.s32.totalorder %s2208_s3, %s1742_s21 }
  0x15   : > { %p1749_p3 = scmp.lt.u32.totalorder %s1742_s21, %s2208_s3 }
  0x16   : > { %p1975_p12 = pnand %p2213_p9, %p1687_p11 }
  0x18   : > { %p1744_p0 = pneg %p1975_p12 }
  0x1a   : > { %p1745_p1 = pnand %p1744_p0, %p1743_p13 }
  0x1c   : > { %p1746_p2 = pneg %p1745_p1 }
  0x1e   : > { %p1751_p4 = pnand %p1749_p3, %p1746_p2 }
  0x20   : > { %1754 = shalt.err (!%p1751_p4)
}
  0x21   : > { %s1755_s9 = scalar_lea.vmem %s224_s15, 6144  ;;  %p1763_p9 = scmp.lt.s32.totalorder %s224_s15, %s224_s15 }
  0x22   : > { %p1756_p7 = scmp.ne.s32.totalorder %s224_s15, %s1755_s9  ;;  %p1764_p6 = scmp.lt.s32.totalorder %s1755_s9, %s1755_s9 }
  0x24   : > { %p1758_p8 = pnand %p1756_p7, %p1744_p0  ;;  %p1765_p5 = por %p1764_p6, %p1763_p9 }
  0x26   : > { %p1759_p11 = pneg %p1758_p8 }
  0x28   : > { %p1766_p10 = pnand %p1765_p5, %p1759_p11 }
  0x2a   : > { %1769 = shalt.err (!%p1766_p10)
}
  0x2b   : > { %s1872_s14 = smov 128   ;;  %s1873_s17 = smov 8  }
  0x2c   : > { %1690 = dma.hbm_to_vmem [thread:$0]  (!%p1975_p12), %s2208_s3, 6144, %s224_s15, [#allocation3], %s1872_s14, %s1872_s14, %s1873_s17  }
  0x2d   : > { %s1770_s23 = scalar_lea.hbm %s2210_s5, 2048 }
  0x2e   : > { %p1771_p13 = scmp.ne.s32.totalorder %s2210_s5, %s1770_s23  ;;  %p1777_p9 = scmp.lt.u32.totalorder %s1770_s23, %s2210_s5 }
  0x30   : > { %p1773_p5 = pnand %p1771_p13, %p1744_p0 }
  0x32   : > { %p1774_p6 = pneg %p1773_p5 }
  0x34   : > { %p1779_p10 = pnand %p1777_p9, %p1774_p6 }
  0x36   : > { %1782 = shalt.err (!%p1779_p10)
}
  0x37   : > { %s1783_s15 = scalar_lea.vmem %s1979_s18, 2048  ;;  %p1791_p4 = scmp.lt.s32.totalorder %s1979_s18, %s1979_s18 }
  0x38   : > { %p1784_p1 = scmp.ne.s32.totalorder %s1979_s18, %s1783_s15  ;;  %p1792_p7 = scmp.lt.s32.totalorder %s1783_s15, %s1783_s15 }
  0x3a   : > { %p1786_p2 = pnand %p1784_p1, %p1744_p0  ;;  %p1793_p8 = por %p1792_p7, %p1791_p4 }
  0x3c   : > { %p1787_p3 = pneg %p1786_p2 }
  0x3e   : > { %p1794_p11 = pnand %p1793_p8, %p1787_p3 }
  0x40   : > { %1797 = shalt.err (!%p1794_p11)
}
  0x41   : > { %1693 = dma.hbm_to_vmem [thread:$0]  (!%p1975_p12), %s2210_s5, 2048, %s1979_s18, [#allocation6], %s1872_s14, %s1872_s14, %s1873_s17  }
  0x42   : > { %p2221_p13 = scmp.ne.s32.totalorder %s2219_s13, 0 }
  0x43   : > { %p2222_p5 = scmp.eq.s32.totalorder (!%p2221_p13), %s1939_s28, 0 }
  0x44   : > { %265 = sbr.rel (%p2221_p13) target bundleno = 837 (0x345), region = 48 }
  0x4b   : > { %1843 = dma.done.wait (%p2222_p5), [#allocation3], 6144   ;;  %p2223_p0 = pmov %p2222_p5 }
  0x4d   : > { %1845 = vsyncadd (%p2223_p0), [#allocation3], 4294961152  ;;  %p2224_p6 = pmov %p2223_p0 }
  0x4e   : > { %p2225_p9 = pmov %p2223_p0 }
  0x4f   : > { %1847 = dma.done.wait (%p2224_p6), [#allocation6], 2048  }
  0x50   : > { %1849 = vsyncadd (%p2225_p9), [#allocation6], 4294965248  ;;  %p300_p10 = scmp.lt.s32.totalorder %s1939_s28, 1  ;;  %v1874_v0 = vmov 0.0|0.0   ;;  %vm1875_vm0 = vmmov 0   ;;  %v1876_v1 = vmov 0.0  }
  0x51   : > { %1563 = vmatprep.subr.bf16.mxu0 %v1874_v0  ;;  %1569 = vmatprep.subr.bf16.mxu1 %v1874_v0  ;;  %v1272_v2 = vld [vmem:[%s2206_s1 + $0x20] sm:$0xff]  ;;  %v1273_v3 = vld [vmem:[%s2206_s1 + $0x28] sm:$0xff]  ;;  %v1274_v7 = vld [vmem:[%s2206_s1 + $0x30] sm:$0xff]  ;;  %vm308_vm1 = vcmask 1040384   ;;  %vm310_vm2 = vcmask 1042432   ;;  %vm323_vm3 = vcmask 261120  }
  0x52   : > { %1389 = vmatprep.mubr.msk.f32.mxu0 %vm1875_vm0, %v1876_v1  ;;  %s301_s13 = scalar_select %p300_p10, %s1939_s28, 1  ;;  %1400 = vmatprep.mubr.msk.f32.mxu1 %vm1875_vm0, %v1876_v1  ;;  %v312_v4 = vld [vmem:[%s2206_s1] sm:$0xff]  ;;  %v1564_v5 = vpack.c.bf16 %v1273_v3, %v1272_v2  ;;  %v313_v6 = vld [vmem:[%s2206_s1 + $0x8] sm:$0xff]  ;;  %v1275_v8 = vld [vmem:[%s2206_s1 + $0x38] sm:$0xff]  ;;  %vm839_vm4 = vcmask 1041408   ;;  %vm841_vm5 = vcmask 1043456  }
  0x53   : > { %v1570_v9 = vpack.c.bf16 %v313_v6, %v312_v4  ;;  %v314_v10 = vld [vmem:[%s2206_s1 + $0x10] sm:$0xff]  ;;  %v315_v11 = vld [vmem:[%s2206_s1 + $0x18] sm:$0xff]  ;;  %v1567_v13 = vpack.c.bf16 %v1275_v8, %v1274_v7  ;;  %v1278_v16 = vld [vmem:[%s2206_s1 + $0x40] sm:$0xff]  ;;  %s297_s14 = sand.u32 1, %s1860_s25   ;;  %s1292_s23 = sshll.u32 %s1939_s28, 5  ;;  %vm1165_vm6 = vcmask 58368  }
  0x54   : > { %s1271_s16 = sshll.u32 %s301_s13, 1  ;;  %1565 = vmatpush3.bf16.msra.mxu0 %v1564_v5  ;;  %v1573_v15 = vpack.c.bf16 %v315_v11, %v314_v10  ;;  %v1279_v17 = vld [vmem:[%s2206_s1 + $0x48] sm:$0xff]  ;;  %v578_v20 = vld [vmem:[#allocation2 + $0x80] sm:$0xff]  ;;  %v1280_v24 = vld [vmem:[%s2206_s1 + $0x50] sm:$0xff]  ;;  %s1270_s20 = sshll.u32 %s297_s14, 1 }
  0x55   : > { %s303_s17 = scalar_lea.vmem %s2205_s0, %s1271_s16  ;;  %1571 = vmatpush3.bf16.msra.mxu1 %v1570_v9  ;;  %1566 = vmatprep.subr.bf16.mxu0 %v1874_v0  ;;  %v579_v21 = vld [vmem:[#allocation2 + $0x88] sm:$0xff]  ;;  %v1576_v23 = vpack.c.bf16 %v1279_v17, %v1278_v16  ;;  %v1281_v25 = vld [vmem:[%s2206_s1 + $0x58] sm:$0xff]  ;;  %v580_v27 = vld [vmem:[#allocation2 + $0x90] sm:$0xff]  ;;  %s299_s29 = scalar_lea.vmem [#allocation7], %s1270_s20 }
  0x56   : > { %v304_v12 = vld [vmem:[%s303_s17] sm:$0x3]  ;;  %1572 = vmatprep.subr.bf16.mxu1 %v1874_v0  ;;  %v1582_v26 = vpack.c.bf16 %v579_v21, %v578_v20  ;;  %v581_v28 = vld [vmem:[#allocation2 + $0x98] sm:$0xff]  ;;  %v1579_v29 = vpack.c.bf16 %v1281_v25, %v1280_v24  ;;  %v562_v31 = vld [vmem:[#allocation2 + $0x8] sm:$0xff]  ;;  %s1181_s8 = sshll.u32 %s299_s29, 4  ;;  %s2163_s15 = scalar_lea.hbm %s2212_s7, %s1292_s23  ;;  %s2165_s8 = int_to_ptr.vmem [resolvable:$true] %s1181_s8 }
  0x57   : > { %v306_v14 = vrot.slane %v304_v12, 7  ;;  %v561_v30 = vld [vmem:[#allocation2] sm:$0xff]  ;;  %v1585_v32 = vpack.c.bf16 %v581_v28, %v580_v27  ;;  %v583_v35 = vld [vmem:[#allocation2 + $0xa8] sm:$0xff]  ;;  %v563_v37 = vld [vmem:[#allocation2 + $0x10] sm:$0xff]  ;;  %s1168_s10 = scalar_lea.sflag [#allocation4], %s297_s14  ;;  %s1798_s19 = scalar_lea.vmem %s2165_s8, 32 }
  0x58   : > { %1568 = vmatpush3.bf16.msra.mxu0 %v1567_v13  ;;  %v582_v34 = vld [vmem:[#allocation2 + $0xa0] sm:$0xff]  ;;  %v1606_v36 = vpack.c.bf16 %v562_v31, %v561_v30  ;;  %v564_v38 = vld [vmem:[#allocation2 + $0x18] sm:$0xff]  ;;  %v566_v42 = vld [vmem:[#allocation2 + $0x28] sm:$0xff]  ;;  %p1799_p12 = scmp.ne.s32.totalorder %s2165_s8, %s1798_s19  ;;  %p2226_p1 = scmp.ne.s32.totalorder %s2217_s11, 0 }
  0x59   : > { %v309_v18 = vsel %vm308_vm1, 0.0, %v306_v14  ;;  %1574 = vmatpush3.bf16.msra.mxu1 %v1573_v15  ;;  %1575 = vmatprep.subr.bf16.mxu0 %v1874_v0  ;;  %v1588_v39 = vpack.c.bf16 %v583_v35, %v582_v34  ;;  %v1609_v40 = vpack.c.bf16 %v564_v38, %v563_v37  ;;  %v565_v41 = vld [vmem:[#allocation2 + $0x20] sm:$0xff]  ;;  %v567_v44 = vld [vmem:[#allocation2 + $0x30] sm:$0xff]  ;;  %v568_v45 = vld [vmem:[#allocation2 + $0x38] sm:$0xff]  ;;  %s1877_s28 = smov [#allocation7]  }
  0x5a   : > { %v311_v19 = vsel %vm310_vm2, %v309_v18, 0.0  ;;  %1581 = vmatprep.subr.bf16.mxu1 %v1874_v0  ;;  %v1612_v43 = vpack.c.bf16 %v566_v42, %v565_v41  ;;  %v1615_v46 = vpack.c.bf16 %v568_v45, %v567_v44  ;;  %v584_v47 = vld [vmem:[#allocation2 + $0xb0] sm:$0xff]  ;;  %v585_v48 = vld [vmem:[#allocation2 + $0xb8] sm:$0xff]  ;;  %v569_v50 = vld [vmem:[#allocation2 + $0x40] sm:$0xff]  ;;  %p1800_p2 = pnand %p1799_p12, %p2226_p1  ;;  %s1802_s13 = sshll.u32 %s1877_s28, 4  ;;  %s1803_s13 = int_to_ptr.vmem [resolvable:$false] %s1802_s13 }
  0x5b   : > { %v322_v22 = vrot.slane %v311_v19, 1  ;;  %v473_v33 = vrot.slane %v311_v19, 2  ;;  %v1591_v49 = vpack.c.bf16 %v585_v48, %v584_v47  ;;  %v570_v51 = vld [vmem:[#allocation2 + $0x48] sm:$0xff]  ;;  %v586_v53 = vld [vmem:[#allocation2 + $0xc0] sm:$0xff]  ;;  %v571_v55 = vld [vmem:[#allocation2 + $0x50] sm:$0xff]  ;;  %s1804_s16 = scalar_lea.vmem %s1803_s13, 64  ;;  %p1805_p4 = scmp.lt.s32.totalorder %s2165_s8, %s1803_s13 }
  0x5c   : > { %1401 = vmatmul.mubr.msk.f32.vlgmr.msra.gmra.mrb[0].mxu1 %vm323_vm3, %v311_v19  ;;  %v1618_v52 = vpack.c.bf16 %v570_v51, %v569_v50  ;;  %v587_v54 = vld [vmem:[#allocation2 + $0xc8] sm:$0xff]  ;;  %v572_v57 = vld [vmem:[#allocation2 + $0x58] sm:$0xff]  ;;  %v588_v59 = vld [vmem:[#allocation2 + $0xd0] sm:$0xff]  ;;  %p1801_p3 = pneg %p1800_p2  ;;  %p1806_p7 = scmp.lt.s32.totalorder %s1804_s16, %s1798_s19 }
  0x5d   : > { %1390 = vmatmul.mubr.msk.f32.vlgmr.msra.gmra.mrb[0].mxu0 %vm323_vm3, %v322_v22  ;;  %1583 = vmatpush3.bf16.msra.mxu1 %v1582_v26  ;;  %v1594_v56 = vpack.c.bf16 %v587_v54, %v586_v53  ;;  %v1621_v58 = vpack.c.bf16 %v572_v57, %v571_v55  ;;  %v589_v60 = vld [vmem:[#allocation2 + $0xd8] sm:$0xff]  ;;  %v573_v62 = vld [vmem:[#allocation2 + $0x60] sm:$0xff]  ;;  %v574_v63 = vld [vmem:[#allocation2 + $0x68] sm:$0xff] }
  0x5e   : > { %1577 = vmatpush3.bf16.msra.mxu0 %v1576_v23  ;;  %1411 = vmatprep.mubr.msk.f32.mxu0 %vm1875_vm0, %v1876_v1  ;;  %v1597_v61 = vpack.c.bf16 %v589_v60, %v588_v59  ;;  %v1624_v2 = vpack.c.bf16 %v574_v63, %v573_v62  ;;  %v590_v3 = vld [vmem:[#allocation2 + $0xe0] sm:$0xff]  ;;  %v591_v4 = vld [vmem:[#allocation2 + $0xe8] sm:$0xff]  ;;  %v575_v6 = vld [vmem:[#allocation2 + $0x70] sm:$0xff]  ;;  %p1807_p8 = por %p1806_p7, %p1805_p4 }
  0x5f   : > { %1578 = vmatprep.subr.bf16.mxu0 %v1874_v0  ;;  %1446 = vmatprep.mubr.msk.f32.mxu1 %vm1875_vm0, %v1876_v1  ;;  %v1600_v5 = vpack.c.bf16 %v591_v4, %v590_v3  ;;  %v576_v7 = vld [vmem:[#allocation2 + $0x78] sm:$0xff]  ;;  %v592_v9 = vld [vmem:[#allocation2 + $0xf0] sm:$0xff]  ;;  %v1283_v18 = vld [vmem:[%s2207_s2] ss:$0 sm:$0xff] }
  0x60   : > { %1584 = vmatprep.subr.bf16.mxu1 %v1874_v0  ;;  %v1627_v8 = vpack.c.bf16 %v576_v7, %v575_v6  ;;  %v593_v10 = vld [vmem:[#allocation2 + $0xf8] sm:$0xff]  ;;  %v738_v24 = vld [vmem:[#allocation2 + $0x100] sm:$0xff]  ;;  %v739_v25 = vld [vmem:[#allocation2 + $0x108] sm:$0xff]  ;;  %p1808_p11 = pnand %p1807_p8, %p1801_p3 }
  0x61   : > { %1586 = vmatpush3.bf16.msra.mxu1 %v1585_v32  ;;  %v1603_v11 = vpack.c.bf16 %v593_v10, %v592_v9  ;;  %v1630_v28 = vpack.c.bf16 %v739_v25, %v738_v24  ;;  %v740_v30 = vld [vmem:[#allocation2 + $0x110] sm:$0xff]  ;;  %v741_v31 = vld [vmem:[#allocation2 + $0x118] sm:$0xff]  ;;  %v743_v34 = vld [vmem:[#allocation2 + $0x128] sm:$0xff] }
  0x62   : > { %1580 = vmatpush3.bf16.msra.mxu0 %v1579_v29  ;;  %1587 = vmatprep.subr.bf16.mxu1 %v1874_v0  ;;  %v1633_v32 = vpack.c.bf16 %v741_v31, %v740_v30  ;;  %v745_v37 = vld [vmem:[#allocation2 + $0x138] sm:$0xff]  ;;  %v748_v42 = vld [vmem:[#allocation2 + $0x150] sm:$0xff]  ;;  %v750_v45 = vld [vmem:[#allocation2 + $0x160] sm:$0xff] }
  0x63   : > { %1605 = vmatprep.subr.bf16.mxu0 %v1874_v0  ;;  %v752_v48 = vld [vmem:[#allocation2 + $0x170] sm:$0xff]  ;;  %v849_v53 = vld [vmem:[#allocation5 + $0x28] sm:$0xff] }
  0x64   : > { %v850_v55 = vld [vmem:[#allocation5 + $0x30] sm:$0xff]  ;;  %v844_v9 = vld [vmem:[#allocation5 + $0x8] sm:$0xff] }
  0x65   : > { %1412 = vmatmul.mubr.msk.f32.vlgmr.msra.gmra.mrb[2].mxu0 %vm323_vm3, %v473_v33  ;;  %1589 = vmatpush3.bf16.msra.mxu1 %v1588_v39  ;;  %v742_v33 = vld [vmem:[#allocation2 + $0x120] sm:$0xff]  ;;  %v1079_v24 = vld [vmem:[#allocation5 + $0x68] sm:$0xff] }
  0x66   : > { %1607 = vmatpush3.bf16.msra.mxu0 %v1606_v36  ;;  %1481 = vmatprep.mubr.msk.f32.mxu0 %vm1875_vm0, %v1876_v1  ;;  %v1636_v35 = vpack.c.bf16 %v743_v34, %v742_v33  ;;  %v744_v36 = vld [vmem:[#allocation2 + $0x130] sm:$0xff]  ;;  %v746_v39 = vld [vmem:[#allocation2 + $0x140] sm:$0xff] }
  0x67   : > { %1608 = vmatprep.subr.bf16.mxu0 %v1874_v0  ;;  %1590 = vmatprep.subr.bf16.mxu1 %v1874_v0  ;;  %v1639_v38 = vpack.c.bf16 %v745_v37, %v744_v36 }
  0x69   : > { %1592 = vmatpush3.bf16.msra.mxu1 %v1591_v49  ;;  %v753_v49 = vld [vmem:[#allocation2 + $0x178] sm:$0xff] }
  0x6a   : > { %1610 = vmatpush3.bf16.msra.mxu0 %v1609_v40  ;;  %1593 = vmatprep.subr.bf16.mxu1 %v1874_v0  ;;  %v747_v40 = vld [vmem:[#allocation2 + $0x148] sm:$0xff]  ;;  %v1651_v50 = vpack.c.bf16 %v753_v49, %v752_v48 }
  0x6b   : > { %1611 = vmatprep.subr.bf16.mxu0 %v1874_v0  ;;  %v1642_v41 = vpack.c.bf16 %v747_v40, %v746_v39 }
  0x6d   : > { %1595 = vmatpush3.bf16.msra.mxu1 %v1594_v56  ;;  %v851_v56 = vld [vmem:[#allocation5 + $0x38] sm:$0xff] }
  0x6e   : > { %1613 = vmatpush3.bf16.msra.mxu0 %v1612_v43  ;;  %1596 = vmatprep.subr.bf16.mxu1 %v1874_v0  ;;  %v749_v43 = vld [vmem:[#allocation2 + $0x158] sm:$0xff]  ;;  %v1657_v57 = vpack.c.bf16 %v851_v56, %v850_v55 }
  0x6f   : > { %1614 = vmatprep.subr.bf16.mxu0 %v1874_v0  ;;  %v1645_v44 = vpack.c.bf16 %v749_v43, %v748_v42 }
  0x71   : > { %1598 = vmatpush3.bf16.msra.mxu1 %v1597_v61 }
  0x72   : > { %1616 = vmatpush3.bf16.msra.mxu0 %v1615_v46  ;;  %1599 = vmatprep.subr.bf16.mxu1 %v1874_v0  ;;  %v751_v46 = vld [vmem:[#allocation2 + $0x168] sm:$0xff] }
  0x73   : > { %1617 = vmatprep.subr.bf16.mxu0 %v1874_v0  ;;  %v1648_v47 = vpack.c.bf16 %v751_v46, %v750_v45 }
  0x75   : > { %1601 = vmatpush3.bf16.msra.mxu1 %v1600_v5 }
  0x76   : > { %1619 = vmatpush3.bf16.msra.mxu0 %v1618_v52  ;;  %1602 = vmatprep.subr.bf16.mxu1 %v1874_v0  ;;  %v848_v52 = vld [vmem:[#allocation5 + $0x20] sm:$0xff] }
  0x77   : > { %1620 = vmatprep.subr.bf16.mxu0 %v1874_v0  ;;  %v1654_v54 = vpack.c.bf16 %v849_v53, %v848_v52 }
  0x79   : > { %1604 = vmatpush3.bf16.msra.mxu1 %v1603_v11 }
  0x7a   : > { %1622 = vmatpush3.bf16.msra.mxu0 %v1621_v58  ;;  %1629 = vmatprep.subr.bf16.mxu1 %v1874_v0 }
  0x7b   : > { %1623 = vmatprep.subr.bf16.mxu0 %v1874_v0 }
  0x7e   : > { %1625 = vmatpush3.bf16.msra.mxu0 %v1624_v2  ;;  %v1285_v2 = vld [vmem:[%s2209_s4] ss:$0 sm:$0xff] }
  0x7f   : > { %1626 = vmatprep.subr.bf16.mxu0 %v1874_v0 }
  0x82   : > { %1628 = vmatpush3.bf16.msra.mxu0 %v1627_v8  ;;  %v843_v8 = vld [vmem:[#allocation5] sm:$0xff] }
  0x83   : > { %1653 = vmatprep.subr.bf16.mxu0 %v1874_v0 }
 0x12f   : > { %v464_v14 = vpop.f32.mrb[0].mxu1 }
 0x130   : > { %v392_v12 = vpop.f32.mrb[0].mxu0  ;;  %v1402_v16 = vpop.f32.mrb[1].mxu1 }
 0x131   : > { %v1391_v13 = vpop.f32.mrb[1].mxu0  ;;  %v465_v15 = vadd.f32 %v464_v14, %v392_v12  ;;  %v1660_v12 = vpack.c.bf16 %v844_v9, %v843_v8  ;;  %v845_v14 = vld [vmem:[#allocation5 + $0x10] sm:$0xff] }
 0x138   : > { %v542_v17 = vpop.f32.mrb[2].mxu0 }
 0x139   : > { %v546_v19 = vadd.f32 %v542_v17, %v465_v15  ;;  %v1413_v20 = vpop.f32.mrb[3].mxu0  ;;  %v846_v15 = vld [vmem:[#allocation5 + $0x18] sm:$0xff]  ;;  %v999_v17 = vld [vmem:[#allocation5 + $0x40] sm:$0xff] }
 0x13a   : > { %v1663_v16 = vpack.c.bf16 %v846_v15, %v845_v14  ;;  %v1001_v20 = vld [vmem:[#allocation5 + $0x50] sm:$0xff] }
 0x13b   : > { %v554_v21 = vadd.f32 %v1283_v18, %v546_v19  ;;  %v1000_v18 = vld [vmem:[#allocation5 + $0x48] sm:$0xff] }
 0x13c   : > { %v1666_v19 = vpack.c.bf16 %v1000_v18, %v999_v17 }
 0x13d   : > { %v555_v22 = vmax.f32 %v554_v21, 0.0  ;;  %v1002_v21 = vld [vmem:[#allocation5 + $0x58] sm:$0xff] }
 0x13f   : > { %v557_v23 = vrot.slane %v555_v22, 7  ;;  %v1669_v22 = vpack.c.bf16 %v1002_v21, %v1001_v20 }
 0x141   : > { %v559_v26 = vsel %vm308_vm1, 0.0, %v557_v23  ;;  %v1078_v23 = vld [vmem:[#allocation5 + $0x60] sm:$0xff] }
 0x142   : > { %v560_v27 = vsel %vm310_vm2, %v559_v26, 0.0  ;;  %1482 = vmatmul.mubr.msk.f32.vlgmr.msra.gmra.mrb[4].mxu0 %vm310_vm2, %v559_v26  ;;  %v1672_v25 = vpack.c.bf16 %v1079_v24, %v1078_v23 }
 0x143   : > { %v595_v29 = vrot.slane %v560_v27, 1  ;;  %1527 = vmatprep.mubr.msk.f32.mxu0 %vm1875_vm0, %v1876_v1  ;;  %v754_v51 = vrot.slane %v560_v27, 2  ;;  %1655 = vmatpush3.bf16.msra.mxu0 %v1654_v54  ;;  %v1080_v27 = vld [vmem:[#allocation5 + $0x70] sm:$0xff] }
 0x144   : > { %1656 = vmatprep.subr.bf16.mxu0 %v1874_v0 }
 0x145   : > { %1447 = vmatmul.mubr.f32.vlgmr.msra.gmra.mrb[2].mxu1 %v595_v29 }
 0x146   : > { %1631 = vmatpush3.bf16.msra.mxu1 %v1630_v28  ;;  %1516 = vmatprep.mubr.msk.f32.mxu1 %vm1875_vm0, %v1876_v1  ;;  %v1081_v28 = vld [vmem:[#allocation5 + $0x78] sm:$0xff] }
 0x147   : > { %1632 = vmatprep.subr.bf16.mxu1 %v1874_v0  ;;  %1658 = vmatpush3.bf16.msra.mxu0 %v1657_v57  ;;  %v1675_v29 = vpack.c.bf16 %v1081_v28, %v1080_v27 }
 0x148   : > { %1659 = vmatprep.subr.bf16.mxu0 %v1874_v0 }
 0x14a   : > { %1634 = vmatpush3.bf16.msra.mxu1 %v1633_v32 }
 0x14b   : > { %1635 = vmatprep.subr.bf16.mxu1 %v1874_v0 }
 0x14e   : > { %1637 = vmatpush3.bf16.msra.mxu1 %v1636_v35 }
 0x14f   : > { %1638 = vmatprep.subr.bf16.mxu1 %v1874_v0 }
 0x152   : > { %1640 = vmatpush3.bf16.msra.mxu1 %v1639_v38 }
 0x153   : > { %1641 = vmatprep.subr.bf16.mxu1 %v1874_v0 }
 0x156   : > { %1643 = vmatpush3.bf16.msra.mxu1 %v1642_v41 }
 0x157   : > { %1644 = vmatprep.subr.bf16.mxu1 %v1874_v0 }
 0x15a   : > { %1646 = vmatpush3.bf16.msra.mxu1 %v1645_v44 }
 0x15b   : > { %1647 = vmatprep.subr.bf16.mxu1 %v1874_v0 }
 0x15e   : > { %1649 = vmatpush3.bf16.msra.mxu1 %v1648_v47 }
 0x15f   : > { %1650 = vmatprep.subr.bf16.mxu1 %v1874_v0 }
 0x162   : > { %1652 = vmatpush3.bf16.msra.mxu1 %v1651_v50 }
 0x165   : > { %1517 = vmatmul.mubr.f32.vlgmr.msra.gmra.mrb[4].mxu1 %v754_v51 }
 0x215   : > { %v733_v58 = vpop.f32.mrb[4].mxu0 }
 0x216   : > { %v1483_v59 = vpop.f32.mrb[5].mxu0 }
 0x218   : > { %v663_v60 = vpop.f32.mrb[2].mxu1 }
 0x219   : > { %v734_v61 = vadd.f32 %v733_v58, %v663_v60  ;;  %v1448_v62 = vpop.f32.mrb[3].mxu1 }
 0x238   : > { %v822_v63 = vpop.f32.mrb[4].mxu1 }
 0x239   : > { %v826_v3 = vadd.f32 %v822_v63, %v734_v61  ;;  %v1518_v4 = vpop.f32.mrb[5].mxu1 }
 0x23b   : > { %v834_v5 = vadd.f32 %v1285_v2, %v826_v3 }
 0x23d   : > { %v835_v6 = vmax.f32 %v834_v5, 0.0 }
 0x23f   : > { %v837_v7 = vrot.slane %v835_v6, 6 }
 0x241   : > { %v840_v10 = vsel %vm839_vm4, 0.0, %v837_v7 }
 0x242   : > { %v842_v11 = vsel %vm841_vm5, %v840_v10, 0.0 }
 0x243   : > { %v853_v13 = vrot.slane %v842_v11, 1  ;;  %v1003_v26 = vrot.slane %v842_v11, 2  ;;  %v1082_v30 = vrot.slane %v842_v11, 3 }
 0x245   : > { %1528 = vmatmul.mubr.msk.f32.vlgmr.msra.gmra.mrb[6].mxu0 %vm323_vm3, %v853_v13 }
 0x246   : > { %1661 = vmatpush3.bf16.msra.mxu0 %v1660_v12  ;;  %1538 = vmatprep.mubr.msk.f32.mxu0 %vm1875_vm0, %v1876_v1 }
 0x247   : > { %1662 = vmatprep.subr.bf16.mxu0 %v1874_v0 }
 0x24a   : > { %1664 = vmatpush3.bf16.msra.mxu0 %v1663_v16 }
 0x24b   : > { %1665 = vmatprep.subr.bf16.mxu0 %v1874_v0 }
 0x24d   : > { %1539 = vmatmul.mubr.msk.f32.vlgmr.msra.gmra.mrb[8].mxu0 %vm323_vm3, %v842_v11 }
 0x24e   : > { %1667 = vmatpush3.bf16.msra.mxu0 %v1666_v19  ;;  %1549 = vmatprep.mubr.msk.f32.mxu0 %vm1875_vm0, %v1876_v1 }
 0x24f   : > { %1668 = vmatprep.subr.bf16.mxu0 %v1874_v0 }
 0x252   : > { %1670 = vmatpush3.bf16.msra.mxu0 %v1669_v22 }
 0x253   : > { %1671 = vmatprep.subr.bf16.mxu0 %v1874_v0 }
 0x255   : > { %1550 = vmatmul.mubr.msk.f32.vlgmr.msra.gmra.mrb[10].mxu0 %vm323_vm3, %v1003_v26 }
 0x256   : > { %1673 = vmatpush3.bf16.msra.mxu0 %v1672_v25  ;;  %1560 = vmatprep.mubr.msk.f32.mxu0 %vm1875_vm0, %v1876_v1 }
 0x257   : > { %1674 = vmatprep.subr.bf16.mxu0 %v1874_v0  ;;  %v1290_v0 = vld [vmem:[%s2211_s6] ss:$0 sm:$0xff] }
 0x25a   : > { %1676 = vmatpush3.bf16.msra.mxu0 %v1675_v29 }
 0x25d   : > { %1561 = vmatmul.mubr.msk.f32.vlgmr.msra.gmra.mrb[12].mxu0 %vm323_vm3, %v1082_v30 }
 0x318   : > { %v922_v31 = vpop.f32.mrb[6].mxu0 }
 0x319   : > { %v1529_v32 = vpop.f32.mrb[7].mxu0 }
 0x320   : > { %v994_v33 = vpop.f32.mrb[8].mxu0 }
 0x321   : > { %v995_v34 = vadd.f32 %v994_v33, %v922_v31  ;;  %v1540_v35 = vpop.f32.mrb[9].mxu0 }
 0x328   : > { %v1072_v36 = vpop.f32.mrb[10].mxu0 }
 0x329   : > { %v1076_v37 = vadd.f32 %v1072_v36, %v995_v34  ;;  %v1551_v38 = vpop.f32.mrb[11].mxu0 }
 0x330   : > { %v1151_v39 = vpop.f32.mrb[12].mxu0 }
 0x331   : > { %v1155_v1 = vadd.f32 %v1151_v39, %v1076_v37  ;;  %v1562_v40 = vpop.f32.mrb[13].mxu0 }
 0x333   : > { %v1163_v41 = vadd.f32 %v1290_v0, %v1155_v1 }
 0x335   : > { %v1164_v42 = vmax.f32 %v1163_v41, 0.0 }
 0x337   : > { %1166 = vst.msk [vmem:[%s299_s29] sm:$0x3] %vm1165_vm6, %v1164_v42 }
 0x338   : > { %1811 = shalt.err (!%p1808_p11)
}
 0x339   : > { %s1812_s18 = scalar_lea.hbm %s2163_s15, 32  ;;  %s1816_s21 = scalar_lea.hbm %s2212_s7, 64 }
 0x33a   : > { %p1813_p13 = scmp.ne.s32.totalorder %s2163_s15, %s1812_s18  ;;  %p1817_p6 = scmp.lt.u32.totalorder %s2163_s15, %s2212_s7 }
 0x33b   : > { %p1818_p9 = scmp.lt.u32.totalorder %s1816_s21, %s1812_s18  ;;  %p1820_p12 = scmp.lt.u32.totalorder %s1812_s18, %s2163_s15 }
 0x33c   : > { %p1814_p5 = pnand %p1813_p13, %p2226_p1 }
 0x33d   : > { %p1819_p10 = por %p1818_p9, %p1817_p6 }
 0x33e   : > { %p1815_p0 = pneg %p1814_p5 }
 0x33f   : > { %p1821_p2 = por %p1820_p12, %p1819_p10 }
 0x341   : > { %p1822_p3 = pnand %p1821_p2, %p1815_p0 }
 0x343   : > { %1825 = shalt.err (!%p1822_p3)
}
 0x344   : > { %1685 = dma.vmem_to_hbm [thread:$0]  (%p2226_p1), %s2165_s8, 32, %s2163_s15, %s1168_s10  }
 0x345 PF: > { %p1702_p4 = scmp.ge.s32.totalorder %s1868_s27, 2  ;;  %s1193_s29 = sand.u32 1, %s1856_s24  }
 0x346   : > { %p2227_p7 = scmp.ne.s32.totalorder %s2218_s12, 0  ;;  %s1194_s17 = scalar_lea.sflag [#allocation4], %s1193_s29 }
 0x348   : > { %p1695_p8 = pnand %p1702_p4, %p2227_p7 }
 0x34a   : > { %1851 = dma.done.wait (!%p1695_p8), %s1194_s17, 32  }
 0x34b   : > { %1853 = vsyncadd (!%p1695_p8), %s1194_s17, 4294967264  ;;  %s2228_s9 = sld [smem:[#allocation11_spill]]  ;;  %p19_p11 = scmp.ge.s32.totalorder %s1943_s30, 4  }
 0x34c   : > { %s2229_s24 = smov %s1860_s25  ;;  %s2230_s25 = smov %s1864_s26 }
 0x34d   : > { %s2232_s27 = smov %s1943_s30  ;;  %21 = sbr.rel (!%p19_p11) target bundleno = 5 (0x5), region = 99 }
 0x351   : > { %s2231_s26 = smov %s2228_s9 }
 0x354   :  { %1199 = vsyncpa [#allocation3], 1 }
 0x355   :  { %1201 = vsyncpa [#allocation3 + $0x1], 1 }
 0x356   :  { %1202 = vsyncpa [#allocation6], 1 }
 0x357   :  { %1203 = vsyncpa [#allocation4], 1 }
 0x358   :  { %1205 = vsyncpa [#allocation4 + $0x1], 1 }

</bundles_post_ra>
